<compile_context>
chip_gen: v7x
topology: tpu7x:2x2x1
jax: 0.10.0
libtpu: 0.0.40
codegen_flags: <defaults>
</compile_context>

<pallas_src>
import functools

import jax
import jax.numpy as jnp
from jax.experimental import pallas as pl
from jax.experimental.pallas import tpu as pltpu


def _rmsnorm_kernel(x_ref, w_ref, o_ref, *, eps: float, inv_dim: float):
    # x_ref: (tile_rows, dim), w_ref: (1, dim), o_ref: (tile_rows, dim)
    x = x_ref[...].astype(jnp.float32)
    # mean(x^2) via sum * (1/dim): avoids a full-width divide.
    ms = jnp.sum(x * x, axis=-1, keepdims=True) * inv_dim
    scale = jnp.sqrt(ms + eps)                 # module multiplies by sqrt (not rsqrt)
    w = w_ref[...].astype(jnp.float32)
    o_ref[...] = ((x * scale) * w).astype(o_ref.dtype)


def rmsnorm(x: jax.Array, weight: jax.Array, eps: float, *, tile_rows: int | None = None) -> jax.Array:
    """RMSNorm (x * sqrt(mean(x^2)+eps)) * weight over the last axis of x."""
    orig_shape = x.shape
    dim = orig_shape[-1]
    assert weight.shape == (dim,)

    x2d = x.reshape(-1, dim)
    rows = x2d.shape[0]
    # Match torch type promotion of (normed_x * weight).
    out_dtype = jnp.result_type(x.dtype, weight.dtype)

    in_item = jnp.dtype(x.dtype).itemsize
    out_item = jnp.dtype(out_dtype).itemsize

    if tile_rows is None:
        # Size rows so the (input block + output block) pair is ~16 MiB; with
        # double buffering that's ~32 MiB of VMEM — safe on v7x (64 MiB) and
        # comfortably inside v5e/v6e (128 MiB), while big enough to reach the
        # HBM roofline (>= ~85% per measured tile-size sweep).
        row_bytes = dim * (in_item + out_item)
        t = (16 << 20) // max(row_bytes, 1)
        t = max(32, (t // 32) * 32)       # multiple of 32: f32/bf16/int8 sublane packing
        tile_rows = int(min(t, 4096))
    if tile_rows >= rows:
        tile_rows = rows                  # single full-extent block (always legal)

    grid = (pl.cdiv(rows, tile_rows),)

    in_block_bytes = tile_rows * dim * in_item
    out_block_bytes = tile_rows * dim * out_item
    w_bytes = dim * jnp.dtype(weight.dtype).itemsize
    vmem_limit = 2 * (in_block_bytes + out_block_bytes) + 2 * w_bytes + (4 << 20)
    vmem_limit = int(min(max(vmem_limit, 16 << 20), 100 << 20))

    w2d = weight.reshape(1, dim)
    kernel = functools.partial(_rmsnorm_kernel, eps=float(eps), inv_dim=1.0 / dim)

    out = pl.pallas_call(
        kernel,
        out_shape=jax.ShapeDtypeStruct((rows, dim), out_dtype),
        grid_spec=pltpu.PrefetchScalarGridSpec(
            num_scalar_prefetch=0,
            grid=grid,
            in_specs=[
                pl.BlockSpec((tile_rows, dim), lambda i: (i, 0)),
                pl.BlockSpec((1, dim), lambda i: (0, 0)),   # weight stays resident
            ],
            out_specs=pl.BlockSpec((tile_rows, dim), lambda i: (i, 0)),
        ),
        compiler_params=pltpu.CompilerParams(
            dimension_semantics=("parallel",),
            vmem_limit_bytes=vmem_limit,
        ),
    )(x2d, w2d)

    return out.reshape(orig_shape)


def rmsnorm_ref(x, weight, eps):
    xf = x.astype(jnp.float32)
    y = xf * jnp.sqrt(jnp.mean(xf * xf, axis=-1, keepdims=True) + eps)
    out_dtype = jnp.result_type(x.dtype, weight.dtype)
    return (y * weight.astype(jnp.float32)).astype(out_dtype)


if __name__ == "__main__":
    key = jax.random.PRNGKey(0)
    eps = 1e-5

    # Small, lane-dense shape (dim multiple of 128) with a non-trivial weight.
    batch, seq, hidden = 2, 8, 256
    kx, kw = jax.random.split(key)
    x = jax.random.normal(kx, (batch, seq, hidden), dtype=jnp.float32)
    weight = 1.0 + 0.1 * jax.random.normal(kw, (hidden,), dtype=jnp.float32)

    out = jax.block_until_ready(rmsnorm(x, weight, eps))
    ref = rmsnorm_ref(x, weight, eps)
    assert out.shape == x.shape and out.dtype == ref.dtype
    assert jnp.allclose(out, ref, atol=1e-5, rtol=1e-5)

    # Also exercise the multi-step grid with a partial last block (no pad/slice path).
    x2 = jax.random.normal(kx, (2, 9, hidden), dtype=jnp.float32)   # 18 rows
    out2 = jax.block_until_ready(rmsnorm(x2, weight, eps, tile_rows=8))  # grid=3, last block partial
    ref2 = rmsnorm_ref(x2, weight, eps)
    assert jnp.allclose(out2, ref2, atol=1e-5, rtol=1e-5)

    print("KERNEL_OK")
</pallas_src>

<mosaic_0001>
module attributes {stable_mosaic.version = 11 : i64} {
  func.func @_rmsnorm_kernel(%arg0: i32, %arg1: memref<16x256xf32, #tpu.memory_space<vmem>>, %arg2: memref<1x256xf32, #tpu.memory_space<vmem>>, %arg3: memref<16x256xf32, #tpu.memory_space<vmem>>) attributes {dimension_semantics = [#tpu.dimension_semantics<parallel>], iteration_bounds = array<i64: 1>, scalar_prefetch = 0 : i64, scratch_operands = 0 : i64, tpu.core_type = #tpu.core_type<tc>, window_params = [{transform_indices = @transform_0, window_bounds = array<i64: 16, 256>}, {pipeline_mode = #tpu.pipeline_mode<synchronous>, transform_indices = @transform_1, window_bounds = array<i64: 1, 256>}, {transform_indices = @transform_2, window_bounds = array<i64: 16, 256>}]} {
    %c0 = arith.constant 0 : index
    %c0_0 = arith.constant 0 : index
    %0 = vector.load %arg1[%c0, %c0_0] : memref<16x256xf32, #tpu.memory_space<vmem>>, vector<16x256xf32>
    %1 = arith.mulf %0, %0 : vector<16x256xf32>
    %cst = arith.constant dense<0.000000e+00> : vector<16xf32>
    %2 = vector.multi_reduction <add>, %1, %cst [1] : vector<16x256xf32> to vector<16xf32>
    %3 = vector.shape_cast %2 : vector<16xf32> to vector<16x1xf32>
    %cst_1 = arith.constant 3.906250e-03 : f32
    %4 = vector.broadcast %cst_1 : f32 to vector<16x1xf32>
    %5 = arith.mulf %3, %4 : vector<16x1xf32>
    %cst_2 = arith.constant 9.99999974E-6 : f32
    %6 = vector.broadcast %cst_2 : f32 to vector<16x1xf32>
    %7 = arith.addf %5, %6 : vector<16x1xf32>
    %8 = math.sqrt %7 : vector<16x1xf32>
    %c0_3 = arith.constant 0 : index
    %c0_4 = arith.constant 0 : index
    %9 = vector.load %arg2[%c0_3, %c0_4] : memref<1x256xf32, #tpu.memory_space<vmem>>, vector<1x256xf32>
    %10 = vector.broadcast %8 : vector<16x1xf32> to vector<16x256xf32>
    %11 = arith.mulf %0, %10 : vector<16x256xf32>
    %12 = vector.broadcast %9 : vector<1x256xf32> to vector<16x256xf32>
    %13 = arith.mulf %11, %12 : vector<16x256xf32>
    %c0_5 = arith.constant 0 : index
    %c0_6 = arith.constant 0 : index
    %14 = vector.load %arg3[%c0_5, %c0_6] : memref<16x256xf32, #tpu.memory_space<vmem>>, vector<16x256xf32>
    tpu.vector_store %arg3[%c0_5, %c0_6], %13 {strides = array<i32>} : memref<16x256xf32, #tpu.memory_space<vmem>>, vector<16x256xf32>,
    return
  }
  func.func @transform_0(%arg0: i32) -> (i32, i32) {
    %c0_i32 = arith.constant 0 : i32
    %c0_i32_0 = arith.constant 0 : i32
    return %arg0, %c0_i32 : i32, i32
  }
  func.func @transform_1(%arg0: i32) -> (i32, i32) {
    %c0_i32 = arith.constant 0 : i32
    %c0_i32_0 = arith.constant 0 : i32
    %c0_i32_1 = arith.constant 0 : i32
    return %c0_i32, %c0_i32_0 : i32, i32
  }
  func.func @transform_2(%arg0: i32) -> (i32, i32) {
    %c0_i32 = arith.constant 0 : i32
    %c0_i32_0 = arith.constant 0 : i32
    return %arg0, %c0_i32 : i32, i32
  }
}

</mosaic_0001>

<bundles_post_ra>
// kernel: tpu_custom_call.1
= control target key start
LH: loop header
LB: loop body
LE: loop exit
PB: predicated region body
PF: predicated region fallthrough
CT: control target
= control target key end

     0   :  { %7 = vsyncpa [#allocation3], 0  ;;  %s207_s0 = inlined_call_operand.hbm [shape: f32[16,256], index: 0, kind: input, shape index: {}]   ;;  %s208_s1 = inlined_call_operand.vmem [shape: f32[1,256], index: 1, kind: input, shape index: {}]   ;;  %s209_s2 = inlined_call_operand.hbm [shape: f32[16,256], index: 2, kind: output, shape index: {}]  }
   0x1   :  { %8 = vsyncpa [#allocation4], 0  ;;  %s155_s9 = smov [#allocation2]   ;;  %s107_s13 = scalar_lea.hbm %s207_s0, 512 }
   0x2   :  { %s14_s10 = sshll.u32 %s155_s9, 4  ;;  %p108_p0 = scmp.ne.s32.totalorder %s207_s0, %s107_s13  ;;  %s15_s10 = int_to_ptr.vmem [resolvable:$true] %s14_s10 }
   0x3   :  { %p111_p1 = scmp.lt.u32.totalorder %s107_s13, %s207_s0 }
   0x5   :  { %p113_p2 = pnand %p111_p1, %p108_p0 }
   0x7   :  { %116 = shalt.err (!%p113_p2)
}
   0x8   :  { %s117_s18 = scalar_lea.vmem %s15_s10, 512  ;;  %p122_p4 = scmp.lt.s32.totalorder %s15_s10, %s15_s10 }
   0x9   :  { %p118_p3 = scmp.ne.s32.totalorder %s15_s10, %s117_s18  ;;  %p123_p5 = scmp.lt.s32.totalorder %s117_s18, %s117_s18 }
   0xb   :  { %p124_p6 = por %p123_p5, %p122_p4 }
   0xd   :  { %p125_p7 = pnand %p124_p6, %p118_p3 }
   0xf   :  { %128 = shalt.err (!%p125_p7)
}
  0x10   :  { %s156_s19 = smov 256   ;;  %s157_s20 = smov 16  }
  0x11   :  { %20 = dma.hbm_to_vmem [thread:$0]  %s207_s0, 512, %s15_s10, [#allocation3], %s156_s19, %s156_s19, %s157_s20  }
  0x12   :  { %151 = dma.done.wait [#allocation3], 512  }
  0x13   :  { %152 = vsyncadd [#allocation3], 4294966784  ;;  %v26_v0 = vld [vmem:[#allocation2] sm:$0xff]  ;;  %v27_v1 = vld [vmem:[#allocation2 + $0x8] sm:$0xff]  ;;  %v64_v15 = vlaneseq }
  0x14   :  { %v28_v2 = vld [vmem:[#allocation2 + $0x10] sm:$0xff]  ;;  %v30_v3 = vmul.f32 %v26_v0, %v26_v0  ;;  %v31_v4 = vmul.f32 %v27_v1, %v27_v1  ;;  %v29_v5 = vld [vmem:[#allocation2 + $0x18] sm:$0xff]  ;;  %v58_v21 = vld [vmem:[%s208_s1] sm:$0x3]  ;;  %s158_s1 = smov [#allocation5]  }
  0x15   :  { %v32_v6 = vmul.f32 %v28_v2, %v28_v2  ;;  %v33_v7 = vmul.f32 %v29_v5, %v29_v5  ;;  %v65_v17 = vshrl.u32 %v64_v15, 7  ;;  %s87_s24 = sshll.u32 %s158_s1, 4  ;;  %s88_s24 = int_to_ptr.vmem [resolvable:$true] %s87_s24 }
  0x16   :  { %v34_v8 = vadd.f32 %v31_v4, %v30_v3  ;;  %s129_s25 = scalar_lea.vmem %s88_s24, 512  ;;  %p134_p9 = scmp.lt.s32.totalorder %s88_s24, %s88_s24 }
  0x17   :  { %v37_v9 = vadd.f32 %v33_v7, %v32_v6  ;;  %v66_v18 = vsub.s32 0, %v65_v17  ;;  %v70_v19 = vsub.s32 1, %v65_v17  ;;  %p130_p8 = scmp.ne.s32.totalorder %s88_s24, %s129_s25  ;;  %p135_p10 = scmp.lt.s32.totalorder %s129_s25, %s129_s25 }
  0x18   :  { %35 = vadd.xlane.f32.xlu0 %v34_v8 }
  0x19   :  { %v67_v25 = vrot.slane %v58_v21, %v66_v18  ;;  %v71_v26 = vrot.slane %v58_v21, %v70_v19  ;;  %p136_p11 = por %p135_p10, %p134_p9 }
  0x1b   :  { %p137_p12 = pnand %p136_p11, %p130_p8 }
  0x1c   :  { %38 = vadd.xlane.f32.xlu0 %v37_v9 }
  0xa5   :  { %v36_v10 = vpop.xlane.xlu0 %35 }
  0xa6   :  { %v40_v11 = vmul.f32 0.00390625, %v36_v10 }
  0xa8   :  { %v42_v12 = vadd.f32 1e-05, %v40_v11 }
  0xa9   :  { %v39_v13 = vpop.xlane.xlu0 %38 }
  0xaa   :  { %103 = vrsqrt.f32 %v42_v12  ;;  %v41_v14 = vmul.f32 0.00390625, %v39_v13  ;;  %vm46_vm0 = vcmp.eq.f32.partialorder %v42_v12, inf  ;;  %v49_v23 = vand.u32 2147483648, %v42_v12 }
  0xab   :  { %vm48_vm1 = vcmp.eq.f32.partialorder %v42_v12, 0.0 }
  0xac   :  { %v43_v16 = vadd.f32 1e-05, %v41_v14 }
  0xae   :  { %105 = vrsqrt.f32 %v43_v16  ;;  %vm53_vm2 = vcmp.eq.f32.partialorder %v43_v16, inf  ;;  %v56_v32 = vand.u32 2147483648, %v43_v16  ;;  %vm55_vm3 = vcmp.eq.f32.partialorder %v43_v16, 0.0 }
  0xb4   :  { %v104_v20 = vpop.eup %103 }
  0xb5   :  { %v45_v22 = vmul.f32 %v104_v20, %v42_v12 }
  0xb7   :  { %v47_v24 = vsel %vm46_vm0, %v42_v12, %v45_v22 }
  0xb8   :  { %v106_v27 = vpop.eup %105  ;;  %v50_v28 = vsel %vm48_vm1, %v49_v23, %v47_v24 }
  0xb9   :  { %v52_v29 = vmul.f32 %v106_v27, %v43_v16  ;;  %v59_v30 = vmul.f32 %v50_v28, %v26_v0  ;;  %v60_v31 = vmul.f32 %v50_v28, %v27_v1 }
  0xbb   :  { %v54_v33 = vsel %vm53_vm2, %v43_v16, %v52_v29  ;;  %v74_v34 = vmul.f32 %v67_v25, %v59_v30  ;;  %v75_v35 = vmul.f32 %v71_v26, %v60_v31 }
  0xbc   :  { %v57_v36 = vsel %vm55_vm3, %v56_v32, %v54_v33 }
  0xbd   :  { %v61_v37 = vmul.f32 %v57_v36, %v28_v2  ;;  %v62_v38 = vmul.f32 %v57_v36, %v29_v5  ;;  %78 = vst [vmem:[#allocation5] sm:$0xff] %v74_v34  ;;  %79 = vst [vmem:[#allocation5 + $0x8] sm:$0xff] %v75_v35 }
  0xbf   :  { %v76_v39 = vmul.f32 %v67_v25, %v61_v37  ;;  %v77_v40 = vmul.f32 %v71_v26, %v62_v38 }
  0xc1   :  { %80 = vst [vmem:[#allocation5 + $0x10] sm:$0xff] %v76_v39  ;;  %81 = vst [vmem:[#allocation5 + $0x18] sm:$0xff] %v77_v40 }
  0xc2   :  { %140 = shalt.err (!%p137_p12)
}
  0xc3   :  { %s141_s28 = scalar_lea.hbm %s209_s2, 512 }
  0xc4   :  { %p142_p13 = scmp.ne.s32.totalorder %s209_s2, %s141_s28  ;;  %p145_p0 = scmp.lt.u32.totalorder %s141_s28, %s209_s2 }
  0xc6   :  { %p147_p1 = pnand %p145_p0, %p142_p13 }
  0xc8   :  { %150 = shalt.err (!%p147_p1)
}
  0xc9   :  { %93 = dma.vmem_to_hbm [thread:$0]  %s88_s24, 512, %s209_s2, [#allocation4], %s156_s19, %s156_s19, %s157_s20  }
  0xca   :  { %153 = dma.done.wait [#allocation4], 512  }
  0xcb   :  { %154 = vsyncadd [#allocation4], 4294966784 }
  0xcc   :  { %97 = vsyncpa [#allocation3], 1 }
  0xcd   :  { %98 = vsyncpa [#allocation4], 1 }

</bundles_post_ra>
